<compile_context>
chip_gen: v6e
topology: v6e:2x2x1
jax: 0.10.0
libtpu: 0.0.40
codegen_flags: <defaults>
</compile_context>

<pallas_src>
import functools

import jax
import jax.numpy as jnp
from jax.experimental import pallas as pl
from jax.experimental.pallas import tpu as pltpu

_EPS = 1e-6        # matches torch.nn.functional.pairwise_distance default eps
_TM_CAP = 8192     # max rows per tile


def _round_up(x, m):
    return ((x + m - 1) // m) * m


def _device_kind():
    try:
        return jax.devices()[0].device_kind.lower()
    except Exception:
        return ""


def _vmem_capacity_bytes():
    try:
        info = pltpu.get_tpu_info()
        cap = getattr(info, "vmem_capacity_bytes", None)
        if cap:
            return int(cap)
    except Exception:
        pass
    return 64 * 1024 * 1024   # conservative: v7x per-TC VMEM size


def _choose_tile_rows(n, d, itemsize, budget_bytes, num_buffers):
    # Per-row VMEM cost:
    #   pipeline buffers : 2 embedding tiles (native dtype) + one label tile
    #                      that is lane-padded to 128 f32 lanes in VMEM,
    #   intermediates    : f32 diff / diff^2 tiles from the in-kernel upcast,
    #   accumulator      : (tm, 1) f32 scratch, lane-padded to 128.
    per_buffer_row = 2 * d * itemsize + 128 * 4
    intermediates_row = 2 * d * 4 + 128 * 4
    tm = budget_bytes // (num_buffers * per_buffer_row + intermediates_row)
    tm = max(8, min(int(tm), _TM_CAP))
    tm = (tm // 8) * 8                      # (8,128) sublane alignment
    tm = min(tm, _round_up(n, 8))
    return max(8, int(tm))


def _contrastive_loss_kernel(o1_ref, o2_ref, label_ref, out_ref, acc_ref,
                             *, margin, n_rows, tm):
    t = pl.program_id(1)
    n_t = pl.num_programs(1)

    @pl.when(t == 0)
    def _():
        acc_ref[...] = jnp.zeros_like(acc_ref)

    # Subtract in the native (possibly bf16) dtype; upcast only the diff.
    diff = (o1_ref[...] - o2_ref[...]).astype(jnp.float32) + _EPS    # (tm, D)
    sq_sum = jnp.sum(diff * diff, axis=-1, keepdims=True)            # (tm, 1)
    dist = jnp.sqrt(sq_sum)                                          # EUP, hinge only

    label = label_ref[...].astype(jnp.float32)                       # (tm, 1)
    hinge = jnp.maximum(margin - dist, 0.0)
    per_sample = (1.0 - label) * sq_sum + label * (hinge * hinge)

    # Mask garbage rows of the ragged last block (no wrapper-side padding)
    # and of any clamped duplicate tiles.  Must stay after all per-sample
    # math and before accumulation.
    tile = pl.program_id(0) * n_t + t
    rows = tile * tm + jax.lax.broadcasted_iota(jnp.int32, (tm, 1), 0)
    per_sample = jnp.where(rows < n_rows, per_sample, 0.0)

    # Row-wise accumulation: plain VPU adds, no per-step reduce / scalar dep.
    acc_ref[...] = acc_ref[...] + per_sample

    @pl.when(t == n_t - 1)
    def _():
        total = jnp.sum(acc_ref[...], keepdims=True)                 # (1, 1)
        out_ref[...] = jnp.broadcast_to(total, (8, 128))


def contrastive_loss(output1, output2, label, margin=1.0):
    """output1, output2: (N, D); label: (N,). Returns scalar float32 loss."""
    n, d = output1.shape
    itemsize = jnp.dtype(output1.dtype).itemsize

    kind = _device_kind()
    is_v7 = "v7" in kind
    num_partials = 2 if is_v7 else 1        # 2 TensorCores only on v7x
    num_buffers = 3 if is_v7 else 2         # short per-step DMA on v7x -> deeper pipe

    capacity = _vmem_capacity_bytes()
    vmem_limit = min(3 * capacity // 4, 96 * 1024 * 1024)
    budget = 3 * vmem_limit // 4            # headroom for compiler-internal scratch

    tm = _choose_tile_rows(n, d, itemsize, budget, num_buffers)

    total_tiles = -(-n // tm)
    if total_tiles < num_partials:
        num_partials = 1
    tiles_per_partial = -(-total_tiles // num_partials)
    grid = (num_partials, tiles_per_partial)

    if total_tiles % num_partials == 0:
        def tile_index(c, t):
            return c * tiles_per_partial + t
    else:
        # Clamp so over-hanging logical tiles of the last partial map to an
        # in-bounds block; the in-kernel row mask discards their contribution.
        last = total_tiles - 1

        def tile_index(c, t):
            return jnp.minimum(c * tiles_per_partial + t, last)

    emb_index = lambda c, t: (tile_index(c, t), 0)

    emb_spec = pl.BlockSpec((tm, d), emb_index)
    if is_v7:
        try:
            emb_spec = pl.BlockSpec((tm, d), emb_index,
                                    pipeline_mode=pl.Buffered(num_buffers))
        except Exception:
            pass   # fall back to default double-buffering
    lbl_spec = pl.BlockSpec((tm, 1), emb_index)
    out_spec = pl.BlockSpec((8, 128), lambda c, t: (c, 0))   # one tile per partial

    label2d = label.reshape(n, 1).astype(jnp.float32)

    kernel = functools.partial(_contrastive_loss_kernel,
                               margin=float(margin), n_rows=n, tm=tm)

    partial_tiles = pl.pallas_call(
        kernel,
        out_shape=jax.ShapeDtypeStruct((num_partials * 8, 128), jnp.float32),
        grid_spec=pltpu.PrefetchScalarGridSpec(
            num_scalar_prefetch=0,
            grid=grid,
            in_specs=[emb_spec, emb_spec, lbl_spec],
            out_specs=out_spec,
            scratch_shapes=[pltpu.VMEM((tm, 1), jnp.float32)],
        ),
        compiler_params=pltpu.CompilerParams(
            dimension_semantics=("parallel", "arbitrary"),
            vmem_limit_bytes=vmem_limit,
        ),
        cost_estimate=pl.CostEstimate(
            flops=3 * n * d + 8 * n,
            transcendentals=n,
            bytes_accessed=2 * n * d * itemsize + 4 * n
            + 4 * num_partials * 8 * 128,
        ),
    )(output1, output2, label2d)

    # Final cross-partial reduce and 1/N scaling in the wrapper.
    partials = partial_tiles[::8, 0]          # (num_partials,)
    return jnp.sum(partials) * (1.0 / n)


def contrastive_loss_ref(output1, output2, label, margin=1.0):
    # pure-JAX reference for sanity checking
    o1 = output1.astype(jnp.float32)
    o2 = output2.astype(jnp.float32)
    diff = o1 - o2 + _EPS
    dist = jnp.sqrt(jnp.sum(diff * diff, axis=-1))
    hinge = jnp.maximum(margin - dist, 0.0)
    return jnp.mean((1.0 - label) * dist**2 + label * hinge**2)


if __name__ == "__main__":
    key = jax.random.PRNGKey(0)
    k1, k2, k3 = jax.random.split(key, 3)

    N, D = 8, 32  # small siamese-embedding-like shapes
    output1 = jax.random.normal(k1, (N, D), dtype=jnp.float32)
    output2 = jax.random.normal(k2, (N, D), dtype=jnp.float32)
    label = jax.random.bernoulli(k3, 0.5, (N,)).astype(jnp.float32)

    loss = contrastive_loss(output1, output2, label, margin=1.0)
    jax.block_until_ready(loss)

    ref = contrastive_loss_ref(output1, output2, label, margin=1.0)
    assert jnp.allclose(loss, ref, rtol=1e-5, atol=1e-5), (loss, ref)

    print("KERNEL_OK")
</pallas_src>

<mosaic_0001>
module attributes {stable_mosaic.version = 11 : i64} {
  func.func @_contrastive_loss_kernel(%arg0: i32, %arg1: i32, %arg2: memref<8x32xf32, #tpu.memory_space<vmem>>, %arg3: memref<8x32xf32, #tpu.memory_space<vmem>>, %arg4: memref<8x1xf32, #tpu.memory_space<vmem>>, %arg5: memref<8x128xf32, #tpu.memory_space<vmem>>, %arg6: memref<8x1xf32, #tpu.memory_space<vmem>>) attributes {dimension_semantics = [#tpu.dimension_semantics<parallel>, #tpu.dimension_semantics<arbitrary>], iteration_bounds = array<i64: 1, 1>, scalar_prefetch = 0 : i64, scratch_operands = 1 : i64, tpu.core_type = #tpu.core_type<tc>, window_params = [{transform_indices = @transform_0, window_bounds = array<i64: 8, 32>}, {transform_indices = @transform_1, window_bounds = array<i64: 8, 32>}, {transform_indices = @transform_2, window_bounds = array<i64: 8, 1>}, {transform_indices = @transform_3, window_bounds = array<i64: 8, 128>}]} {
    %c0_i32 = arith.constant 0 : i32
    %0 = arith.cmpi eq, %arg1, %c0_i32 : i32
    %1 = arith.extui %0 : i1 to i32
    %c0_i32_0 = arith.constant 0 : i32
    %2 = arith.cmpi ne, %1, %c0_i32_0 : i32
    scf.if %2 {
      %cst_18 = arith.constant 0.000000e+00 : f32
      %39 = vector.broadcast %cst_18 : f32 to vector<8x1xf32>
      %c0_19 = arith.constant 0 : index
      %c0_20 = arith.constant 0 : index
      %40 = vector.load %arg6[%c0_19, %c0_20] : memref<8x1xf32, #tpu.memory_space<vmem>>, vector<8x1xf32>
      tpu.vector_store %arg6[%c0_19, %c0_20], %39 {strides = array<i32>} : memref<8x1xf32, #tpu.memory_space<vmem>>, vector<8x1xf32>,
    } else {
    }
    %c0 = arith.constant 0 : index
    %c0_1 = arith.constant 0 : index
    %3 = vector.load %arg2[%c0, %c0_1] : memref<8x32xf32, #tpu.memory_space<vmem>>, vector<8x32xf32>
    %c0_2 = arith.constant 0 : index
    %c0_3 = arith.constant 0 : index
    %4 = vector.load %arg3[%c0_2, %c0_3] : memref<8x32xf32, #tpu.memory_space<vmem>>, vector<8x32xf32>
    %5 = arith.subf %3, %4 : vector<8x32xf32>
    %cst = arith.constant 9.99999997E-7 : f32
    %6 = vector.broadcast %cst : f32 to vector<8x32xf32>
    %7 = arith.addf %5, %6 : vector<8x32xf32>
    %8 = arith.mulf %7, %7 : vector<8x32xf32>
    %cst_4 = arith.constant dense<0.000000e+00> : vector<8xf32>
    %9 = vector.multi_reduction <add>, %8, %cst_4 [1] : vector<8x32xf32> to vector<8xf32>
    %10 = vector.shape_cast %9 : vector<8xf32> to vector<8x1xf32>
    %11 = math.sqrt %10 : vector<8x1xf32>
    %c0_5 = arith.constant 0 : index
    %c0_6 = arith.constant 0 : index
    %12 = vector.load %arg4[%c0_5, %c0_6] : memref<8x1xf32, #tpu.memory_space<vmem>>, vector<8x1xf32>
    %cst_7 = arith.constant 1.000000e+00 : f32
    %13 = vector.broadcast %cst_7 : f32 to vector<8x1xf32>
    %14 = arith.subf %13, %11 : vector<8x1xf32>
    %cst_8 = arith.constant 0.000000e+00 : f32
    %15 = vector.broadcast %cst_8 : f32 to vector<8x1xf32>
    %16 = arith.maximumf %14, %15 : vector<8x1xf32>
    %cst_9 = arith.constant 1.000000e+00 : f32
    %17 = vector.broadcast %cst_9 : f32 to vector<8x1xf32>
    %18 = arith.subf %17, %12 : vector<8x1xf32>
    %19 = arith.mulf %18, %10 : vector<8x1xf32>
    %20 = arith.mulf %16, %16 : vector<8x1xf32>
    %21 = arith.mulf %12, %20 : vector<8x1xf32>
    %22 = arith.addf %19, %21 : vector<8x1xf32>
    %c1_i32 = arith.constant 1 : i32
    %23 = arith.muli %arg0, %c1_i32 : i32
    %24 = arith.addi %23, %arg1 : i32
    %c8_i32 = arith.constant 8 : i32
    %25 = arith.muli %24, %c8_i32 : i32
    %26 = tpu.iota {dimensions = array<i32: 0>} : vector<8x1xi32>
    %27 = vector.broadcast %25 : i32 to vector<8x1xi32>
    %28 = arith.addi %27, %26 : vector<8x1xi32>
    %c8_i32_10 = arith.constant 8 : i32
    %29 = vector.broadcast %c8_i32_10 : i32 to vector<8x1xi32>
    %30 = arith.cmpi slt, %28, %29 : vector<8x1xi32>
    %cst_11 = arith.constant 0.000000e+00 : f32
    %31 = vector.broadcast %cst_11 : f32 to vector<8x1xf32>
    %32 = arith.select %30, %22, %31 : vector<8x1xi1>, vector<8x1xf32>
    %c0_12 = arith.constant 0 : index
    %c0_13 = arith.constant 0 : index
    %33 = vector.load %arg6[%c0_12, %c0_13] : memref<8x1xf32, #tpu.memory_space<vmem>>, vector<8x1xf32>
    %34 = arith.addf %33, %32 : vector<8x1xf32>
    %c0_14 = arith.constant 0 : index
    %c0_15 = arith.constant 0 : index
    %35 = vector.load %arg6[%c0_14, %c0_15] : memref<8x1xf32, #tpu.memory_space<vmem>>, vector<8x1xf32>
    tpu.vector_store %arg6[%c0_14, %c0_15], %34 {strides = array<i32>} : memref<8x1xf32, #tpu.memory_space<vmem>>, vector<8x1xf32>,
    %c0_i32_16 = arith.constant 0 : i32
    %36 = arith.cmpi eq, %arg1, %c0_i32_16 : i32
    %37 = arith.extui %36 : i1 to i32
    %c0_i32_17 = arith.constant 0 : i32
    %38 = arith.cmpi ne, %37, %c0_i32_17 : i32
    scf.if %38 {
      %c0_18 = arith.constant 0 : index
      %c0_19 = arith.constant 0 : index
      %39 = vector.load %arg6[%c0_18, %c0_19] : memref<8x1xf32, #tpu.memory_space<vmem>>, vector<8x1xf32>
      %40 = vector.shape_cast %39 : vector<8x1xf32> to vector<1x8x1xf32>
      %cst_20 = arith.constant dense<0.000000e+00> : vector<1xf32>
      %41 = vector.multi_reduction <add>, %40, %cst_20 [1, 2] : vector<1x8x1xf32> to vector<1xf32>
      %42 = vector.shape_cast %41 : vector<1xf32> to vector<1x1x1xf32>
      %43 = vector.extract %42[0, 0, 0] : f32 from vector<1x1x1xf32>
      %44 = vector.broadcast %43 : f32 to vector<1x1xf32>
      %45 = vector.shape_cast %44 : vector<1x1xf32> to vector<1x1xf32>
      %46 = vector.broadcast %45 : vector<1x1xf32> to vector<8x128xf32>
      %c0_21 = arith.constant 0 : index
      %c0_22 = arith.constant 0 : index
      %47 = vector.load %arg5[%c0_21, %c0_22] : memref<8x128xf32, #tpu.memory_space<vmem>>, vector<8x128xf32>
      tpu.vector_store %arg5[%c0_21, %c0_22], %46 {strides = array<i32>} : memref<8x128xf32, #tpu.memory_space<vmem>>, vector<8x128xf32>,
    } else {
    }
    return
  }
  func.func @transform_0(%arg0: i32, %arg1: i32) -> (i32, i32) {
    %c1_i32 = arith.constant 1 : i32
    %0 = arith.muli %arg0, %c1_i32 : i32
    %1 = arith.addi %0, %arg1 : i32
    %c0_i32 = arith.constant 0 : i32
    %c0_i32_0 = arith.constant 0 : i32
    return %1, %c0_i32 : i32, i32
  }
  func.func @transform_1(%arg0: i32, %arg1: i32) -> (i32, i32) {
    %c1_i32 = arith.constant 1 : i32
    %0 = arith.muli %arg0, %c1_i32 : i32
    %1 = arith.addi %0, %arg1 : i32
    %c0_i32 = arith.constant 0 : i32
    %c0_i32_0 = arith.constant 0 : i32
    return %1, %c0_i32 : i32, i32
  }
  func.func @transform_2(%arg0: i32, %arg1: i32) -> (i32, i32) {
    %c1_i32 = arith.constant 1 : i32
    %0 = arith.muli %arg0, %c1_i32 : i32
    %1 = arith.addi %0, %arg1 : i32
    %c0_i32 = arith.constant 0 : i32
    %c0_i32_0 = arith.constant 0 : i32
    return %1, %c0_i32 : i32, i32
  }
  func.func @transform_3(%arg0: i32, %arg1: i32) -> (i32, i32) {
    %c0_i32 = arith.constant 0 : i32
    %c0_i32_0 = arith.constant 0 : i32
    return %arg0, %c0_i32 : i32, i32
  }
}

</mosaic_0001>

<bundles_post_ra>
// kernel: tpu_custom_call.1
= control target key start
LH: loop header
LB: loop body
LE: loop exit
PB: predicated region body
PF: predicated region fallthrough
CT: control target
= control target key end

     0   :  { %8 = vsyncpa [#allocation4], 0  ;;  %s239_s0 = inlined_call_operand.vmem [shape: f32[8,32], index: 0, kind: input, shape index: {}]   ;;  %s240_s1 = inlined_call_operand.hbm [shape: f32[8,32], index: 1, kind: input, shape index: {}]   ;;  %s241_s2 = inlined_call_operand.vmem [shape: f32[8,1], index: 2, kind: input, shape index: {}]   ;;  %s242_s3 = inlined_call_operand.hbm [shape: f32[8,128], index: 3, kind: output, shape index: {}]  }
   0x1   :  { %9 = vsyncpa [#allocation5], 0  ;;  %s201_s12 = smov [#allocation3]  }
   0x2   :  { %s27_s13 = sshll.u32 %s201_s12, 4  ;;  %s28_s13 = int_to_ptr.vmem [resolvable:$true] %s27_s13 }
   0x3   :  { %s165_s14 = scalar_lea.vmem %s28_s13, 128  ;;  %p170_p1 = scmp.lt.s32.totalorder %s28_s13, %s28_s13 }
   0x4   :  { %p166_p0 = scmp.ne.s32.totalorder %s28_s13, %s165_s14  ;;  %p171_p2 = scmp.lt.s32.totalorder %s165_s14, %s165_s14 }
   0x6   :  { %p172_p3 = por %p171_p2, %p170_p1 }
   0x8   :  { %p173_p4 = pnand %p172_p3, %p166_p0 }
   0xa   :  { %176 = shalt.err (!%p173_p4)
}
   0xb   :  { %30 = dma.hbm_to_vmem [thread:$0]  %s240_s1, 128, %s28_s13, [#allocation4]  }
   0xc   :  { %197 = dma.done.wait [#allocation4], 128  }
   0xd   :  { %198 = vsyncadd [#allocation4], 4294967168  ;;  %v71_v0 = vld [vmem:[%s239_s0] sm:$0xff]  ;;  %v72_v1 = vld [vmem:[#allocation3] sm:$0xff]  ;;  %vm76_vm0 = vcmask 261120   ;;  %vm69_vm1 = vcmask 7168  }
   0xe   :  { %v73_v2 = vsub.f32 %v71_v0, %v72_v1  ;;  %v202_v6 = vmov 0.0   ;;  %v87_v12 = vld [vmem:[%s241_s2] sm:$0xff]  ;;  %s203_s2 = smov [#allocation6]  }
   0xf   :  { %70 = vst.msk [vmem:[#allocation2] sm:$0xff] %vm69_vm1, %v202_v6  ;;  %v90_v15 = vsub.f32 1.0, %v87_v12  ;;  %s129_s19 = sshll.u32 %s203_s2, 4  ;;  %s130_s19 = int_to_ptr.vmem [resolvable:$true] %s129_s19 }
  0x10   :  { %v74_v3 = vadd.f32 1e-06, %v73_v2  ;;  %s177_s21 = scalar_lea.vmem %s130_s19, 128  ;;  %p182_p6 = scmp.lt.s32.totalorder %s130_s19, %s130_s19 }
  0x11   :  { %p178_p5 = scmp.ne.s32.totalorder %s130_s19, %s177_s21  ;;  %p183_p7 = scmp.lt.s32.totalorder %s177_s21, %s177_s21 }
  0x12   :  { %v75_v4 = vmul.f32 %v74_v3, %v74_v3 }
  0x13   :  { %p184_p8 = por %p183_p7, %p182_p6 }
  0x14   :  { %v77_v5 = vsel %vm76_vm0, %v75_v4, 0.0 }
  0x15   :  { %78 = vadd.xlane.f32.xlu0 %v77_v5  ;;  %p185_p9 = pnand %p184_p8, %p178_p5 }
  0x16   :  { %v103_v20 = vld [vmem:[#allocation2] sm:$0xff] }
  0x9e   :  { %v79_v7 = vpop.xlane.xlu0 %78 }
  0x9f   :  { %155 = vrsqrt.f32 %v79_v7  ;;  %vm82_vm2 = vcmp.eq.f32.partialorder %v79_v7, inf  ;;  %v85_v10 = vand.u32 2147483648, %v79_v7  ;;  %vm84_vm3 = vcmp.eq.f32.partialorder %v79_v7, 0.0 }
  0xa0   :  { %v91_v18 = vmul.f32 %v90_v15, %v79_v7 }
  0xac   :  { %v156_v8 = vpop.eup %155 }
  0xad   :  { %v81_v9 = vmul.f32 %v156_v8, %v79_v7 }
  0xaf   :  { %v83_v11 = vsel %vm82_vm2, %v79_v7, %v81_v9 }
  0xb0   :  { %v86_v13 = vsel %vm84_vm3, %v85_v10, %v83_v11 }
  0xb1   :  { %v88_v14 = vsub.f32 1.0, %v86_v13 }
  0xb3   :  { %v89_v16 = vmax.f32 %v88_v14, 0.0 }
  0xb5   :  { %v92_v17 = vmul.f32 %v89_v16, %v89_v16 }
  0xb7   :  { %v93_v19 = vmul.f32 %v92_v17, %v87_v12 }
  0xb9   :  { %v94_v21 = vadd.f32 %v93_v19, %v91_v18 }
  0xbb   :  { %v104_v22 = vadd.f32 %v103_v20, %v94_v21 }
  0xbd   :  { %106 = vst.msk [vmem:[#allocation2] sm:$0xff] %vm69_vm1, %v104_v22 }
  0xc4   :  { %v110_v23 = vld [vmem:[#allocation2] sm:$0xff] }
  0xc5   :  { %v111_v24 = vsel %vm69_vm1, %v110_v23, 0.0 }
  0xc6   :  { %112 = vadd.xlane.f32.xlu0 %v111_v24 }
 0x14f   :  { %v113_v25 = vpop.xlane.xlu0 %112 }
 0x150   :  { %v114_v26 = vrot.slane %v113_v25, 4 }
 0x152   :  { %v115_v27 = vadd.f32 %v114_v26, %v113_v25 }
 0x154   :  { %v116_v28 = vrot.slane %v115_v27, 2 }
 0x156   :  { %v117_v29 = vadd.f32 %v116_v28, %v115_v27 }
 0x158   :  { %v118_v30 = vrot.slane %v117_v29, 1 }
 0x15a   :  { %v119_v31 = vadd.f32 %v118_v30, %v117_v29 }
 0x15c   :  { %150 = vpush %v119_v31 }
 0x18d   :  { %s151_s20 = spop %150 }
 0x18e   :  { %v121_v32 = vstv %s151_s20 }
 0x18f   :  { %122 = vst [vmem:[#allocation6] sm:$0xff] %v121_v32 }
 0x190   :  { %188 = shalt.err (!%p185_p9)
}
 0x191   :  { %132 = dma.vmem_to_hbm [thread:$0]  %s130_s19, 128, %s242_s3, [#allocation5]  }
 0x192   :  { %199 = dma.done.wait [#allocation5], 128  }
 0x193   :  { %200 = vsyncadd [#allocation5], 4294967168 }
 0x194   :  { %136 = vsyncpa [#allocation4], 1 }
 0x195   :  { %137 = vsyncpa [#allocation5], 1 }

</bundles_post_ra>
